<compile_context>
chip_gen: v6e
topology: v6e:2x2x1
jax: 0.10.0
libtpu: 0.0.40
codegen_flags: <defaults>
</compile_context>

<pallas_src>
import jax
import jax.numpy as jnp
from jax.experimental import pallas as pl
from jax.experimental.pallas import tpu as pltpu

INPUT_SIZE = 10
HIDDEN_SIZE = 16
OUTPUT_SIZE = 69
DEFAULT_BATCH_TILE = 2048  # rows per grid step; few-MiB VMEM footprint, far under limits


def _round_up(n, m):
    return ((n + m - 1) // m) * m


def mlp_kernel(x_ref, w1_ref, b1_ref, w2_ref, b2_ref, o_ref):
    # Two MXU matmuls + VPU bias-add / ReLU on VMEM-resident tiles.
    # MXU has huge slack under the HBM roofline here -- do NOT pad K/hidden.
    h = jnp.dot(x_ref[...], w1_ref[...], preferred_element_type=jnp.float32)
    h = jnp.maximum(h + b1_ref[...], 0.0)                       # (tb, 16)
    y = jnp.dot(h, w2_ref[...], preferred_element_type=jnp.float32)
    o_ref[...] = (y + b2_ref[...]).astype(o_ref.dtype)          # (tb, 69)


def simple_linear_model(x, w1, b1, w2, b2, *,
                        batch_tile=DEFAULT_BATCH_TILE,
                        out_dtype=jnp.float32):
    """x: (B, INPUT_SIZE) -> (B, OUTPUT_SIZE). Weights pre-transposed: (in, out)."""
    B = x.shape[0]

    # Batch tile: multiple of 8 (sublanes). Cap so the grid has >=2 steps when
    # possible (v7x megacore sharding); never exceed batch_tile.
    tb = min(batch_tile, max(8, _round_up(pl.cdiv(B, 2), 8)))
    grid = (pl.cdiv(B, tb),)

    return pl.pallas_call(
        mlp_kernel,
        out_shape=jax.ShapeDtypeStruct((B, OUTPUT_SIZE), out_dtype),
        grid_spec=pl.GridSpec(
            grid=grid,
            in_specs=[
                # Streaming batch tiles (ragged last block handled by Pallas).
                pl.BlockSpec((tb, INPUT_SIZE), lambda i: (i, 0)),
                # Weights / biases: same block every step -> resident in VMEM.
                pl.BlockSpec((INPUT_SIZE, HIDDEN_SIZE), lambda i: (0, 0)),
                pl.BlockSpec((1, HIDDEN_SIZE), lambda i: (0, 0)),
                pl.BlockSpec((HIDDEN_SIZE, OUTPUT_SIZE), lambda i: (0, 0)),
                pl.BlockSpec((1, OUTPUT_SIZE), lambda i: (0, 0)),
            ],
            out_specs=pl.BlockSpec((tb, OUTPUT_SIZE), lambda i: (i, 0)),
        ),
        compiler_params=pltpu.CompilerParams(
            # Batch tiles are independent -> shard across TensorCores on v7x.
            dimension_semantics=("parallel",),
            vmem_limit_bytes=32 * 1024 * 1024,
        ),
    )(x, w1, b1, w2, b2)


def init_params(key):
    """Deterministic init mirroring nn.Linear shapes, stored transposed: (in, out)."""
    k1, k2, k3, k4 = jax.random.split(key, 4)
    lim1 = 1.0 / jnp.sqrt(float(INPUT_SIZE))
    lim2 = 1.0 / jnp.sqrt(float(HIDDEN_SIZE))
    w1 = jax.random.uniform(k1, (INPUT_SIZE, HIDDEN_SIZE), jnp.float32, -lim1, lim1)
    b1 = jax.random.uniform(k2, (1, HIDDEN_SIZE), jnp.float32, -lim1, lim1)
    w2 = jax.random.uniform(k3, (HIDDEN_SIZE, OUTPUT_SIZE), jnp.float32, -lim2, lim2)
    b2 = jax.random.uniform(k4, (1, OUTPUT_SIZE), jnp.float32, -lim2, lim2)
    return w1, b1, w2, b2


if __name__ == "__main__":
    key = jax.random.PRNGKey(0)
    kx, kp = jax.random.split(key)
    w1, b1, w2, b2 = init_params(kp)

    # Small batch consistent with the module (input_size=10).
    batch = 8
    x = jax.random.normal(kx, (batch, INPUT_SIZE), jnp.float32)
    out = jax.block_until_ready(simple_linear_model(x, w1, b1, w2, b2))

    ref = jnp.maximum(x @ w1 + b1, 0.0) @ w2 + b2
    assert out.shape == (batch, OUTPUT_SIZE)
    assert jnp.allclose(out, ref, atol=1e-5, rtol=1e-5)

    # Larger, non-tile-aligned batch to exercise the ragged-last-block path
    # and the >=2-grid-step (megacore) tiling.
    big = 1031
    xb = jax.random.normal(kx, (big, INPUT_SIZE), jnp.float32)
    out_b = jax.block_until_ready(simple_linear_model(xb, w1, b1, w2, b2))
    ref_b = jnp.maximum(xb @ w1 + b1, 0.0) @ w2 + b2
    assert out_b.shape == (big, OUTPUT_SIZE)
    assert jnp.allclose(out_b, ref_b, atol=1e-5, rtol=1e-5)

    print("KERNEL_OK")
</pallas_src>

<mosaic_0001>
module attributes {stable_mosaic.version = 11 : i64} {
  func.func @mlp_kernel(%arg0: i32, %arg1: memref<8x10xf32, #tpu.memory_space<vmem>>, %arg2: memref<10x16xf32, #tpu.memory_space<vmem>>, %arg3: memref<1x16xf32, #tpu.memory_space<vmem>>, %arg4: memref<16x69xf32, #tpu.memory_space<vmem>>, %arg5: memref<1x69xf32, #tpu.memory_space<vmem>>, %arg6: memref<8x69xf32, #tpu.memory_space<vmem>>) attributes {dimension_semantics = [#tpu.dimension_semantics<parallel>], iteration_bounds = array<i64: 1>, scalar_prefetch = 0 : i64, scratch_operands = 0 : i64, tpu.core_type = #tpu.core_type<tc>, window_params = [{transform_indices = @transform_0, window_bounds = array<i64: 8, 10>}, {pipeline_mode = #tpu.pipeline_mode<synchronous>, transform_indices = @transform_1, window_bounds = array<i64: 10, 16>}, {pipeline_mode = #tpu.pipeline_mode<synchronous>, transform_indices = @transform_2, window_bounds = array<i64: 1, 16>}, {pipeline_mode = #tpu.pipeline_mode<synchronous>, transform_indices = @transform_3, window_bounds = array<i64: 16, 69>}, {pipeline_mode = #tpu.pipeline_mode<synchronous>, transform_indices = @transform_4, window_bounds = array<i64: 1, 69>}, {transform_indices = @transform_5, window_bounds = array<i64: 8, 69>}]} {
    %c0 = arith.constant 0 : index
    %c0_0 = arith.constant 0 : index
    %0 = vector.load %arg1[%c0, %c0_0] : memref<8x10xf32, #tpu.memory_space<vmem>>, vector<8x10xf32>
    %c0_1 = arith.constant 0 : index
    %c0_2 = arith.constant 0 : index
    %1 = vector.load %arg2[%c0_1, %c0_2] : memref<10x16xf32, #tpu.memory_space<vmem>>, vector<10x16xf32>
    %cst = arith.constant dense<0.000000e+00> : vector<8x16xf32>
    %2 = tpu.matmul %0, %1, %cst {dimension_numbers = #tpu.dot_dimension_numbers<[1], [0], [0], [1], [0, 0, 1, 1], [], []>} : vector<8x10xf32>, vector<10x16xf32>, vector<8x16xf32> -> vector<8x16xf32>
    %c0_3 = arith.constant 0 : index
    %c0_4 = arith.constant 0 : index
    %3 = vector.load %arg3[%c0_3, %c0_4] : memref<1x16xf32, #tpu.memory_space<vmem>>, vector<1x16xf32>
    %4 = vector.broadcast %3 : vector<1x16xf32> to vector<8x16xf32>
    %5 = arith.addf %2, %4 : vector<8x16xf32>
    %cst_5 = arith.constant 0.000000e+00 : f32
    %6 = vector.broadcast %cst_5 : f32 to vector<8x16xf32>
    %7 = arith.maximumf %5, %6 : vector<8x16xf32>
    %c0_6 = arith.constant 0 : index
    %c0_7 = arith.constant 0 : index
    %8 = vector.load %arg4[%c0_6, %c0_7] : memref<16x69xf32, #tpu.memory_space<vmem>>, vector<16x69xf32>
    %cst_8 = arith.constant dense<0.000000e+00> : vector<8x69xf32>
    %9 = tpu.matmul %7, %8, %cst_8 {dimension_numbers = #tpu.dot_dimension_numbers<[1], [0], [0], [1], [0, 0, 1, 1], [], []>} : vector<8x16xf32>, vector<16x69xf32>, vector<8x69xf32> -> vector<8x69xf32>
    %c0_9 = arith.constant 0 : index
    %c0_10 = arith.constant 0 : index
    %10 = vector.load %arg5[%c0_9, %c0_10] : memref<1x69xf32, #tpu.memory_space<vmem>>, vector<1x69xf32>
    %11 = vector.broadcast %10 : vector<1x69xf32> to vector<8x69xf32>
    %12 = arith.addf %9, %11 : vector<8x69xf32>
    %c0_11 = arith.constant 0 : index
    %c0_12 = arith.constant 0 : index
    %13 = vector.load %arg6[%c0_11, %c0_12] : memref<8x69xf32, #tpu.memory_space<vmem>>, vector<8x69xf32>
    tpu.vector_store %arg6[%c0_11, %c0_12], %12 {strides = array<i32>} : memref<8x69xf32, #tpu.memory_space<vmem>>, vector<8x69xf32>,
    return
  }
  func.func @transform_0(%arg0: i32) -> (i32, i32) {
    %c0_i32 = arith.constant 0 : i32
    %c0_i32_0 = arith.constant 0 : i32
    return %arg0, %c0_i32 : i32, i32
  }
  func.func @transform_1(%arg0: i32) -> (i32, i32) {
    %c0_i32 = arith.constant 0 : i32
    %c0_i32_0 = arith.constant 0 : i32
    %c0_i32_1 = arith.constant 0 : i32
    return %c0_i32, %c0_i32_0 : i32, i32
  }
  func.func @transform_2(%arg0: i32) -> (i32, i32) {
    %c0_i32 = arith.constant 0 : i32
    %c0_i32_0 = arith.constant 0 : i32
    %c0_i32_1 = arith.constant 0 : i32
    return %c0_i32, %c0_i32_0 : i32, i32
  }
  func.func @transform_3(%arg0: i32) -> (i32, i32) {
    %c0_i32 = arith.constant 0 : i32
    %c0_i32_0 = arith.constant 0 : i32
    %c0_i32_1 = arith.constant 0 : i32
    return %c0_i32, %c0_i32_0 : i32, i32
  }
  func.func @transform_4(%arg0: i32) -> (i32, i32) {
    %c0_i32 = arith.constant 0 : i32
    %c0_i32_0 = arith.constant 0 : i32
    %c0_i32_1 = arith.constant 0 : i32
    return %c0_i32, %c0_i32_0 : i32, i32
  }
  func.func @transform_5(%arg0: i32) -> (i32, i32) {
    %c0_i32 = arith.constant 0 : i32
    %c0_i32_0 = arith.constant 0 : i32
    return %arg0, %c0_i32 : i32, i32
  }
}

</mosaic_0001>

<bundles_post_ra>
// kernel: tpu_custom_call.1
= control target key start
LH: loop header
LB: loop body
LE: loop exit
PB: predicated region body
PF: predicated region fallthrough
CT: control target
= control target key end

     0   :  { %10 = vsyncpa [#allocation3], 0  ;;  %s425_s0 = inlined_call_operand.hbm [shape: f32[8,10], index: 0, kind: input, shape index: {}]   ;;  %s426_s1 = inlined_call_operand.hbm [shape: f32[10,16], index: 1, kind: input, shape index: {}]   ;;  %s427_s2 = inlined_call_operand.vmem [shape: f32[1,16], index: 2, kind: input, shape index: {}]   ;;  %s428_s3 = inlined_call_operand.hbm [shape: f32[16,69], index: 3, kind: input, shape index: {}]   ;;  %s429_s4 = inlined_call_operand.vmem [shape: f32[1,69], index: 4, kind: input, shape index: {}]   ;;  %s430_s5 = inlined_call_operand.hbm [shape: f32[8,69], index: 5, kind: output, shape index: {}]  }
   0x1   :  { %11 = vsyncpa [#allocation6], 0 }
   0x2   :  { %12 = vsyncpa [#allocation4], 0  ;;  %s369_s18 = smov [#allocation5]  }
   0x3   :  { %s28_s19 = sshll.u32 %s369_s18, 4  ;;  %s29_s19 = int_to_ptr.vmem [resolvable:$true] %s28_s19 }
   0x4   :  { %s291_s20 = scalar_lea.vmem %s29_s19, 256  ;;  %p296_p1 = scmp.lt.s32.totalorder %s29_s19, %s29_s19 }
   0x5   :  { %p292_p0 = scmp.ne.s32.totalorder %s29_s19, %s291_s20  ;;  %p297_p2 = scmp.lt.s32.totalorder %s291_s20, %s291_s20 }
   0x7   :  { %p298_p3 = por %p297_p2, %p296_p1 }
   0x9   :  { %p299_p4 = pnand %p298_p3, %p292_p0 }
   0xb   :  { %302 = shalt.err (!%p299_p4)
}
   0xc   :  { %s370_s21 = smov 128   ;;  %s371_s22 = smov 8  }
   0xd   :  { %34 = dma.hbm_to_vmem [thread:$0]  %s426_s1, 256, %s29_s19, [#allocation6], %s370_s21, %s370_s21, %s371_s22  }
   0xe   :  { %s372_s25 = smov [#allocation2]   ;;  %s373_s27 = smov [#allocation7]  }
   0xf   :  { %s19_s26 = sshll.u32 %s372_s25, 4  ;;  %s42_s28 = sshll.u32 %s373_s27, 4  ;;  %s20_s26 = int_to_ptr.vmem [resolvable:$true] %s19_s26  ;;  %s43_s28 = int_to_ptr.vmem [resolvable:$true] %s42_s28 }
  0x10   :  { %s311_s29 = scalar_lea.vmem %s20_s26, 128  ;;  %p316_p6 = scmp.lt.s32.totalorder %s20_s26, %s20_s26 }
  0x11   :  { %p312_p5 = scmp.ne.s32.totalorder %s20_s26, %s311_s29  ;;  %p317_p7 = scmp.lt.s32.totalorder %s311_s29, %s311_s29 }
  0x13   :  { %p318_p8 = por %p317_p7, %p316_p6 }
  0x15   :  { %p319_p9 = pnand %p318_p8, %p312_p5 }
  0x17   :  { %322 = shalt.err (!%p319_p9)
}
  0x18   :  { %22 = dma.hbm_to_vmem [thread:$0]  %s425_s0, 128, %s20_s26, [#allocation3]  }
  0x19   :  { %s331_s7 = scalar_lea.vmem %s43_s28, 256  ;;  %p336_p11 = scmp.lt.s32.totalorder %s43_s28, %s43_s28 }
  0x1a   :  { %p332_p10 = scmp.ne.s32.totalorder %s43_s28, %s331_s7  ;;  %p337_p12 = scmp.lt.s32.totalorder %s331_s7, %s331_s7 }
  0x1c   :  { %p338_p13 = por %p337_p12, %p336_p11 }
  0x1e   :  { %p339_p0 = pnand %p338_p13, %p332_p10 }
  0x20   :  { %342 = shalt.err (!%p339_p0)
}
  0x21   :  { %48 = dma.hbm_to_vmem [thread:$0]  %s428_s3, 256, %s43_s28, [#allocation6], %s370_s21, %s370_s21, %s371_s22  }
  0x22   :  { %363 = dma.done.wait [#allocation3], 128  }
  0x23   :  { %364 = vsyncadd [#allocation3], 4294967168 }
  0x24   :  { %365 = dma.done.wait [#allocation6], 512  }
  0x25   :  { %366 = vsyncadd [#allocation6], 4294966784  ;;  %v374_v0 = vmov 0.0   ;;  %vm375_vm0 = vmmov 0   ;;  %vm74_vm1 = vcmask 1041408   ;;  %v61_v2 = vld [vmem:[#allocation5] sm:$0xff] }
  0x26   :  { %261 = vmatprep.subr.mxu0 %v374_v0  ;;  %265 = vmatprep.mubr.msk.f32.mxu0 %vm375_vm0, %v374_v0  ;;  %v62_v1 = vld [vmem:[#allocation5 + $0x8] sm:$0x3]  ;;  %v60_v3 = vld [vmem:[#allocation2] sm:$0xff]  ;;  %vm70_vm2 = vcmask 80896   ;;  %v149_v5 = vld [vmem:[#allocation7] sm:$0xff]  ;;  %vm158_vm3 = vcmask 130048  }
  0x27   :  { %268 = vmatprep.subr.mxu1 %v374_v0  ;;  %272 = vmatprep.mubr.msk.f32.mxu1 %vm375_vm0, %v374_v0  ;;  %v150_v4 = vld [vmem:[#allocation7 + $0x8] sm:$0xff]  ;;  %s376_s11 = smov [#allocation8]   ;;  %vm232_vm4 = vcmask 564224  }
  0x28   :  { %262 = vmatpush3.msk.msra.mxu0 %vm74_vm1, %v62_v1  ;;  %269 = vmatpush3.msra.mxu1 %v150_v4  ;;  %v250_v6 = vld [vmem:[%s427_s2] ss:$0 sm:$0xff]  ;;  %s240_s12 = sshll.u32 %s376_s11, 4  ;;  %s241_s12 = int_to_ptr.vmem [resolvable:$true] %s240_s12 }
  0x29   :  { %263 = vmatprep.subr.mxu0 %v374_v0  ;;  %270 = vmatprep.subr.mxu1 %v374_v0  ;;  %v253_v11 = vld [vmem:[%s429_s4] ss:$0 sm:$0xff]  ;;  %s343_s13 = scalar_lea.vmem %s241_s12, 128  ;;  %p348_p2 = scmp.lt.s32.totalorder %s241_s12, %s241_s12 }
  0x2a   :  { %264 = vmatpush3.msra.mxu0 %v61_v2  ;;  %271 = vmatpush3.msra.mxu1 %v149_v5  ;;  %p344_p1 = scmp.ne.s32.totalorder %s241_s12, %s343_s13  ;;  %p349_p3 = scmp.lt.s32.totalorder %s343_s13, %s343_s13 }
  0x2b   :  { %266 = vmatmul.mubr.msk.f32.vlgmr.msra.gmra.mxu0 %vm70_vm2, %v60_v3 }
  0x2c   :  { %p350_p4 = por %p349_p3, %p348_p2 }
  0x2e   :  { %p351_p5 = pnand %p350_p4, %p344_p1 }
  0xeb   :  { %v144_v7 = vpop.f32.mrf.mxu0 }
  0xec   :  { %v145_v8 = vadd.f32 %v250_v6, %v144_v7 }
  0xed   :  { %v267_v9 = vpop.f32.mrf.mxu0 }
  0xee   :  { %v148_v10 = vmax.f32 %v145_v8, 0.0 }
  0xf0   :  { %273 = vmatmul.mubr.msk.f32.vlgmr.msra.gmra.mxu1 %vm158_vm3, %v148_v10 }
 0x1b0   :  { %v228_v12 = vpop.f32.mrf.mxu1 }
 0x1b1   :  { %v229_v13 = vadd.f32 %v253_v11, %v228_v12 }
 0x1b2   :  { %v274_v14 = vpop.f32.mrf.mxu1 }
 0x1b3   :  { %233 = vst.msk [vmem:[#allocation8] sm:$0xff] %vm232_vm4, %v229_v13 }
 0x1b4   :  { %354 = shalt.err (!%p351_p5)
}
 0x1b5   :  { %243 = dma.vmem_to_hbm [thread:$0]  %s241_s12, 128, %s430_s5, [#allocation4]  }
 0x1b6   :  { %367 = dma.done.wait [#allocation4], 128  }
 0x1b7   :  { %368 = vsyncadd [#allocation4], 4294967168 }
 0x1b8   :  { %247 = vsyncpa [#allocation3], 1 }
 0x1b9   :  { %248 = vsyncpa [#allocation6], 1 }
 0x1ba   :  { %249 = vsyncpa [#allocation4], 1 }

</bundles_post_ra>
